<compile_context>
chip_gen: v6e
topology: v6e:2x2x1
jax: 0.10.0
libtpu: 0.0.40
codegen_flags: <defaults>
</compile_context>

<pallas_src>
import jax
import jax.numpy as jnp
from jax import lax
from jax.experimental import pallas as pl
from jax.experimental.pallas import tpu as pltpu


def _pick_tile_v(V):
    # Lane-dense vocab tile (multiple of 128), small enough for v7x VMEM.
    for tv in (512, 256, 128):
        if V % tv == 0:
            return tv
    return V  # ragged / tiny vocab: single full-width tile


def _logits_kernel(emb_ref, w_ref, b_ref, out_ref):
    # emb: (B, K), w: (tV, K)  -> contract K on both operands (no transpose).
    acc = lax.dot_general(
        emb_ref[...], w_ref[...],
        dimension_numbers=(((1,), (1,)), ((), ())),
        preferred_element_type=jnp.float32,
    )
    out_ref[...] = (acc + b_ref[...]).astype(out_ref.dtype)


def _fused_kernel(emb_ref, w_ref, b_ref, tgt_ref, logits_ref, loss_ref,
                  m_sc, l_sc, t_sc):
    # One vocab tile per grid step: matmul + bias, write logits tile, and
    # accumulate an online logsumexp + target-logit gather for the CE loss.
    j = pl.program_id(0)

    @pl.when(j == 0)
    def _():
        m_sc[...] = jnp.full(m_sc.shape, -jnp.inf, jnp.float32)
        l_sc[...] = jnp.zeros(l_sc.shape, jnp.float32)
        t_sc[...] = jnp.zeros(t_sc.shape, jnp.float32)

    logits = lax.dot_general(
        emb_ref[...], w_ref[...],
        dimension_numbers=(((1,), (1,)), ((), ())),
        preferred_element_type=jnp.float32,
    ) + b_ref[...]
    logits_ref[...] = logits.astype(logits_ref.dtype)

    # Online logsumexp across vocab tiles (all reductions stay 2-D).
    m_prev = m_sc[...]
    m_new = jnp.maximum(m_prev, jnp.max(logits, axis=-1, keepdims=True))
    l_sc[...] = l_sc[...] * jnp.exp(m_prev - m_new) + jnp.sum(
        jnp.exp(logits - m_new), axis=-1, keepdims=True)
    m_sc[...] = m_new

    # Target logit: only contributes when the target lane is in this tile.
    B, tV = logits.shape
    lane = lax.broadcasted_iota(jnp.int32, (B, tV), 1) + j * tV
    onehot = (lane == tgt_ref[...]).astype(jnp.float32)
    t_sc[...] = t_sc[...] + jnp.sum(logits * onehot, axis=-1, keepdims=True)

    @pl.when(j == pl.num_programs(0) - 1)
    def _():
        lse = m_sc[...] + jnp.log(l_sc[...])          # (B, 1)
        loss_ref[0, 0] = jnp.mean(lse - t_sc[...])


def ngram_forward(x, embed_w, fc_w, fc_b, targets=None, *,
                  compute_dtype=jnp.bfloat16, tile_v=None):
    """Pallas implementation of NGram.forward.

    x:        (B, n) int32 token ids
    embed_w:  (V, E) f32
    fc_w:     (V, n*E) f32   (PyTorch nn.Linear layout: out_features x in_features)
    fc_b:     (V,)  f32
    """
    B = x.shape[0]
    V = fc_w.shape[0]

    # Embedding gather kept in JAX (indexing glue).
    emb = embed_w[x].reshape(B, -1).astype(compute_dtype)      # (B, K)
    K = emb.shape[1]
    w = jnp.asarray(fc_w).astype(compute_dtype)                # (V, K), no transpose
    b = jnp.asarray(fc_b, jnp.float32).reshape(1, V)

    tv = tile_v or _pick_tile_v(V)
    n_tiles = V // tv

    emb_spec = pl.BlockSpec((B, K), lambda j: (0, 0))
    w_spec = pl.BlockSpec((tv, K), lambda j: (j, 0))
    b_spec = pl.BlockSpec((1, tv), lambda j: (0, j))
    logits_spec = pl.BlockSpec((B, tv), lambda j: (0, j))

    if targets is None:
        logits = pl.pallas_call(
            _logits_kernel,
            out_shape=jax.ShapeDtypeStruct((B, V), jnp.float32),
            grid_spec=pltpu.PrefetchScalarGridSpec(
                num_scalar_prefetch=0,
                grid=(n_tiles,),
                in_specs=[emb_spec, w_spec, b_spec],
                out_specs=logits_spec,
            ),
            compiler_params=pltpu.CompilerParams(
                dimension_semantics=("parallel",)),
        )(emb, w, b)
        return logits

    tgt = jnp.asarray(targets, jnp.int32).reshape(B, 1)
    tgt_spec = pl.BlockSpec((B, 1), lambda j: (0, 0))
    loss_spec = pl.BlockSpec((1, 1), lambda j: (0, 0))

    logits, loss = pl.pallas_call(
        _fused_kernel,
        out_shape=(jax.ShapeDtypeStruct((B, V), jnp.float32),
                   jax.ShapeDtypeStruct((1, 1), jnp.float32)),
        grid_spec=pltpu.PrefetchScalarGridSpec(
            num_scalar_prefetch=0,
            grid=(n_tiles,),
            in_specs=[emb_spec, w_spec, b_spec, tgt_spec],
            out_specs=[logits_spec, loss_spec],
            scratch_shapes=[pltpu.VMEM((B, 1), jnp.float32),   # running max
                            pltpu.VMEM((B, 1), jnp.float32),   # running sum
                            pltpu.VMEM((B, 1), jnp.float32)],  # target logit
        ),
        # Vocab axis carries the CE reduction -> "arbitrary".
        compiler_params=pltpu.CompilerParams(
            dimension_semantics=("arbitrary",)),
    )(emb, w, b, tgt)
    return logits, loss[0, 0]


if __name__ == "__main__":
    # Module hyperparameters (synthetic, deterministic init)
    n = 4
    vocab_size = 128
    embed_size = 8
    B = 8

    key = jax.random.PRNGKey(0)
    k_emb, k_w, k_b, k_x, k_t = jax.random.split(key, 5)

    embed_w = jax.random.normal(k_emb, (vocab_size, embed_size), jnp.float32)
    # nn.Linear default init ~ U(-1/sqrt(fan_in), 1/sqrt(fan_in))
    bound = 1.0 / jnp.sqrt(n * embed_size)
    fc_w = jax.random.uniform(k_w, (vocab_size, n * embed_size), jnp.float32,
                              -bound, bound)
    fc_b = jax.random.uniform(k_b, (vocab_size,), jnp.float32, -bound, bound)

    x = jax.random.randint(k_x, (B, n), 0, vocab_size, jnp.int32)
    targets = jax.random.randint(k_t, (B,), 0, vocab_size, jnp.int32)

    # Plain-JAX reference
    ref_logits = embed_w[x].reshape(B, -1) @ fc_w.T + fc_b
    ref_lse = jax.scipy.special.logsumexp(ref_logits, axis=-1)
    ref_loss = jnp.mean(ref_lse - ref_logits[jnp.arange(B), targets])

    # f32 path: tight correctness check (logits-only + fused logits/loss).
    logits_f32 = ngram_forward(x, embed_w, fc_w, fc_b,
                               compute_dtype=jnp.float32)
    logits_f32b, loss_f32 = ngram_forward(x, embed_w, fc_w, fc_b, targets,
                                          compute_dtype=jnp.float32)
    jax.block_until_ready((logits_f32, logits_f32b, loss_f32))
    assert jnp.allclose(logits_f32, ref_logits, atol=5e-4, rtol=5e-4)
    assert jnp.allclose(logits_f32b, ref_logits, atol=5e-4, rtol=5e-4)
    assert jnp.allclose(loss_f32, ref_loss, atol=5e-4, rtol=5e-4)

    # bf16 weight-streaming path (default; fused logits + CE in one launch).
    logits_bf16, loss_bf16 = ngram_forward(x, embed_w, fc_w, fc_b, targets)
    jax.block_until_ready((logits_bf16, loss_bf16))
    assert jnp.allclose(logits_bf16, ref_logits, atol=1e-1, rtol=1e-1)
    assert jnp.allclose(loss_bf16, ref_loss, atol=5e-2, rtol=5e-2)

    print("KERNEL_OK")
</pallas_src>

<mosaic_0001>
module attributes {stable_mosaic.version = 11 : i64} {
  func.func @_logits_kernel(%arg0: i32, %arg1: memref<8x32xf32, #tpu.memory_space<vmem>>, %arg2: memref<128x32xf32, #tpu.memory_space<vmem>>, %arg3: memref<1x128xf32, #tpu.memory_space<vmem>>, %arg4: memref<8x128xf32, #tpu.memory_space<vmem>>) attributes {dimension_semantics = [#tpu.dimension_semantics<parallel>], iteration_bounds = array<i64: 1>, scalar_prefetch = 0 : i64, scratch_operands = 0 : i64, tpu.core_type = #tpu.core_type<tc>, window_params = [{pipeline_mode = #tpu.pipeline_mode<synchronous>, transform_indices = @transform_0, window_bounds = array<i64: 8, 32>}, {transform_indices = @transform_1, window_bounds = array<i64: 128, 32>}, {transform_indices = @transform_2, window_bounds = array<i64: 1, 128>}, {transform_indices = @transform_3, window_bounds = array<i64: 8, 128>}]} {
    %c0 = arith.constant 0 : index
    %c0_0 = arith.constant 0 : index
    %0 = vector.load %arg1[%c0, %c0_0] : memref<8x32xf32, #tpu.memory_space<vmem>>, vector<8x32xf32>
    %c0_1 = arith.constant 0 : index
    %c0_2 = arith.constant 0 : index
    %1 = vector.load %arg2[%c0_1, %c0_2] : memref<128x32xf32, #tpu.memory_space<vmem>>, vector<128x32xf32>
    %cst = arith.constant dense<0.000000e+00> : vector<8x128xf32>
    %2 = tpu.matmul %0, %1, %cst {dimension_numbers = #tpu.dot_dimension_numbers<[1], [1], [0], [0], [0, 0, 1, 0], [], []>} : vector<8x32xf32>, vector<128x32xf32>, vector<8x128xf32> -> vector<8x128xf32>
    %c0_3 = arith.constant 0 : index
    %c0_4 = arith.constant 0 : index
    %3 = vector.load %arg3[%c0_3, %c0_4] : memref<1x128xf32, #tpu.memory_space<vmem>>, vector<1x128xf32>
    %4 = vector.broadcast %3 : vector<1x128xf32> to vector<8x128xf32>
    %5 = arith.addf %2, %4 : vector<8x128xf32>
    %c0_5 = arith.constant 0 : index
    %c0_6 = arith.constant 0 : index
    %6 = vector.load %arg4[%c0_5, %c0_6] : memref<8x128xf32, #tpu.memory_space<vmem>>, vector<8x128xf32>
    tpu.vector_store %arg4[%c0_5, %c0_6], %5 {strides = array<i32>} : memref<8x128xf32, #tpu.memory_space<vmem>>, vector<8x128xf32>,
    return
  }
  func.func @transform_0(%arg0: i32) -> (i32, i32) {
    %c0_i32 = arith.constant 0 : i32
    %c0_i32_0 = arith.constant 0 : i32
    %c0_i32_1 = arith.constant 0 : i32
    return %c0_i32, %c0_i32_0 : i32, i32
  }
  func.func @transform_1(%arg0: i32) -> (i32, i32) {
    %c0_i32 = arith.constant 0 : i32
    %c0_i32_0 = arith.constant 0 : i32
    return %arg0, %c0_i32 : i32, i32
  }
  func.func @transform_2(%arg0: i32) -> (i32, i32) {
    %c0_i32 = arith.constant 0 : i32
    %c0_i32_0 = arith.constant 0 : i32
    return %c0_i32, %arg0 : i32, i32
  }
  func.func @transform_3(%arg0: i32) -> (i32, i32) {
    %c0_i32 = arith.constant 0 : i32
    %c0_i32_0 = arith.constant 0 : i32
    return %c0_i32, %arg0 : i32, i32
  }
}

</mosaic_0001>

<bundles_post_ra>
// kernel: tpu_custom_call.1
= control target key start
LH: loop header
LB: loop body
LE: loop exit
PB: predicated region body
PF: predicated region fallthrough
CT: control target
= control target key end

     0   :  { %vm39_vm0 = vcmask 261120   ;;  %v271_v1 = vmov 0.0   ;;  %vm272_vm1 = vmmov 0   ;;  %s368_s0 = inlined_call_operand.vmem [shape: f32[8,32], index: 0, kind: input, shape index: {}]   ;;  %s369_s1 = inlined_call_operand.vmem [shape: f32[128,32], index: 1, kind: input, shape index: {}]   ;;  %s370_s2 = inlined_call_operand.vmem [shape: f32[1,128], index: 2, kind: input, shape index: {}]   ;;  %s371_s3 = inlined_call_operand.hbm [shape: f32[8,128], index: 3, kind: output, shape index: {}]  }
   0x1   :  { %v31_v0 = vld [vmem:[%s369_s1 + $0x78] sm:$0xff]  ;;  %211 = vmatprep.subr.mxu0 %v271_v1  ;;  %243 = vmatprep.mubr.msk.f32.mxu0 %vm272_vm1, %v271_v1  ;;  %v30_v2 = vld [vmem:[%s369_s1 + $0x70] sm:$0xff] }
   0x2   :  { %212 = vmatpush3.xpose.msk.msra.mxu0 %vm39_vm0, %v31_v0 }
   0x3   :  { %213 = vmatprep.subr.mxu0 %v271_v1 }
   0x6   :  { %214 = vmatpush3.xpose.msk.msra.mxu0 %vm39_vm0, %v30_v2 }
   0x7   :  { %8 = vsyncpa [#allocation3], 0  ;;  %215 = vmatprep.subr.mxu0 %v271_v1  ;;  %v29_v3 = vld [vmem:[%s369_s1 + $0x68] sm:$0xff]  ;;  %v28_v4 = vld [vmem:[%s369_s1 + $0x60] sm:$0xff]  ;;  %s273_s21 = smov [#allocation2]  }
   0x8   :  { %v27_v5 = vld [vmem:[%s369_s1 + $0x58] sm:$0xff]  ;;  %v26_v6 = vld [vmem:[%s369_s1 + $0x50] sm:$0xff]  ;;  %v25_v7 = vld [vmem:[%s369_s1 + $0x48] sm:$0xff]  ;;  %s168_s22 = sshll.u32 %s273_s21, 4  ;;  %s169_s22 = int_to_ptr.vmem [resolvable:$true] %s168_s22 }
   0x9   :  { %v24_v8 = vld [vmem:[%s369_s1 + $0x40] sm:$0xff]  ;;  %v23_v9 = vld [vmem:[%s369_s1 + $0x38] sm:$0xff]  ;;  %v22_v10 = vld [vmem:[%s369_s1 + $0x30] sm:$0xff]  ;;  %p254_p1 = scmp.lt.s32.totalorder %s169_s22, %s169_s22 }
   0xa   :  { %216 = vmatpush3.xpose.msk.msra.mxu0 %vm39_vm0, %v29_v3  ;;  %v21_v11 = vld [vmem:[%s369_s1 + $0x28] sm:$0xff]  ;;  %v20_v12 = vld [vmem:[%s369_s1 + $0x20] sm:$0xff]  ;;  %v19_v13 = vld [vmem:[%s369_s1 + $0x18] sm:$0xff] }
   0xb   :  { %217 = vmatprep.subr.mxu0 %v271_v1  ;;  %v18_v14 = vld [vmem:[%s369_s1 + $0x10] sm:$0xff]  ;;  %v17_v15 = vld [vmem:[%s369_s1 + $0x8] sm:$0xff]  ;;  %v16_v16 = vld [vmem:[%s369_s1] sm:$0xff]  ;;  %s249_s1 = scalar_lea.vmem %s169_s22, 128 }
   0xc   :  { %v15_v17 = vld [vmem:[%s368_s0] sm:$0xff]  ;;  %p250_p0 = scmp.ne.s32.totalorder %s169_s22, %s249_s1  ;;  %p255_p2 = scmp.lt.s32.totalorder %s249_s1, %s249_s1 }
   0xd   :  { %v176_v18 = vld [vmem:[%s370_s2] ss:$0 sm:$0xff] }
   0xe   :  { %218 = vmatpush3.xpose.msk.msra.mxu0 %vm39_vm0, %v28_v4  ;;  %p256_p3 = por %p255_p2, %p254_p1 }
   0xf   :  { %219 = vmatprep.subr.mxu0 %v271_v1 }
  0x10   :  { %p257_p4 = pnand %p256_p3, %p250_p0 }
  0x12   :  { %220 = vmatpush3.xpose.msk.msra.mxu0 %vm39_vm0, %v27_v5 }
  0x13   :  { %221 = vmatprep.subr.mxu0 %v271_v1 }
  0x16   :  { %222 = vmatpush3.xpose.msk.msra.mxu0 %vm39_vm0, %v26_v6 }
  0x17   :  { %223 = vmatprep.subr.mxu0 %v271_v1 }
  0x1a   :  { %224 = vmatpush3.xpose.msk.msra.mxu0 %vm39_vm0, %v25_v7 }
  0x1b   :  { %225 = vmatprep.subr.mxu0 %v271_v1 }
  0x1e   :  { %226 = vmatpush3.xpose.msk.msra.mxu0 %vm39_vm0, %v24_v8 }
  0x1f   :  { %227 = vmatprep.subr.mxu0 %v271_v1 }
  0x22   :  { %228 = vmatpush3.xpose.msk.msra.mxu0 %vm39_vm0, %v23_v9 }
  0x23   :  { %229 = vmatprep.subr.mxu0 %v271_v1 }
  0x26   :  { %230 = vmatpush3.xpose.msk.msra.mxu0 %vm39_vm0, %v22_v10 }
  0x27   :  { %231 = vmatprep.subr.mxu0 %v271_v1 }
  0x2a   :  { %232 = vmatpush3.xpose.msk.msra.mxu0 %vm39_vm0, %v21_v11 }
  0x2b   :  { %233 = vmatprep.subr.mxu0 %v271_v1 }
  0x2e   :  { %234 = vmatpush3.xpose.msk.msra.mxu0 %vm39_vm0, %v20_v12 }
  0x2f   :  { %235 = vmatprep.subr.mxu0 %v271_v1 }
  0x32   :  { %236 = vmatpush3.xpose.msk.msra.mxu0 %vm39_vm0, %v19_v13 }
  0x33   :  { %237 = vmatprep.subr.mxu0 %v271_v1 }
  0x36   :  { %238 = vmatpush3.xpose.msk.msra.mxu0 %vm39_vm0, %v18_v14 }
  0x37   :  { %239 = vmatprep.subr.mxu0 %v271_v1 }
  0x3a   :  { %240 = vmatpush3.xpose.msk.msra.mxu0 %vm39_vm0, %v17_v15 }
  0x3b   :  { %241 = vmatprep.subr.mxu0 %v271_v1 }
  0x3e   :  { %242 = vmatpush3.xpose.msk.msra.mxu0 %vm39_vm0, %v16_v16 }
  0x41   :  { %244 = vmatmul.mubr.msk.f32.vlgmr.msra.gmra.mxu0 %vm39_vm0, %v15_v17 }
 0x101   :  { %v157_v19 = vpop.f32.mrf.mxu0 }
 0x102   :  { %v158_v20 = vadd.f32 %v176_v18, %v157_v19 }
 0x103   :  { %v245_v21 = vpop.f32.mrf.mxu0 }
 0x104   :  { %161 = vst [vmem:[#allocation2] sm:$0xff] %v158_v20 }
 0x105   :  { %260 = shalt.err (!%p257_p4)
}
 0x106   :  { %171 = dma.vmem_to_hbm [thread:$0]  %s169_s22, 128, %s371_s3, [#allocation3]  }
 0x107   :  { %269 = dma.done.wait [#allocation3], 128  }
 0x108   :  { %270 = vsyncadd [#allocation3], 4294967168 }
 0x109   :  { %175 = vsyncpa [#allocation3], 1 }

</bundles_post_ra>
